<compile_context>
chip_gen: v7x
topology: tpu7x:2x2x1
jax: 0.10.0
libtpu: 0.0.40
codegen_flags: <defaults>
</compile_context>

<pallas_src>
from functools import partial

import numpy as np
import jax
import jax.numpy as jnp
from jax import lax
from jax.experimental import pallas as pl
from jax.experimental.pallas import tpu as pltpu

K = 3        # conv kernel size (both convs: padding=0, stride=1, bias=False)
POOL = 2     # MaxPool2d(kernel_size=2) -> stride 2
SUBLANE = 8  # f32 sublane tile


def down_kernel(H, W, G, compute_dtype, x_ref, w1_ref, w2_ref, sel_ref, o_ref):
    """One group of G images per grid step, channels on sublanes / flat spatial on lanes.

    x_ref  : (Cin_p , G*H*W)       flattened input slab (row-major n,h,w on lanes)
    w1_ref : (Cmid_p, K*K*Cin_p)   conv1 im2col weight matrix
    w2_ref : (Cout  , K*K*Cmid_p)  conv2 im2col weight matrix
    sel_ref: (1, G*Hp*Wp) int32    flat slab position of each pooled 2x2 window
    o_ref  : (Cout, G*Hp*Wp)       pooled output slab (single lane-dense store)
    """
    H1, W1 = H - (K - 1), W - (K - 1)      # after conv1 (valid)
    H2, W2 = H1 - (K - 1), W1 - (K - 1)    # after conv2 (valid)
    HW = H * W
    # "Full-width" flattened lengths: valid pixel (g,h,w) lives at lane
    # g*H*W + h*W + w; lanes with w >= W1/W2 (and image-boundary rows) hold
    # garbage that provably never feeds a valid downstream output, so each conv
    # is one dense matmul over the whole slab (reads end exactly at the slab's
    # last lane).
    L1 = (G - 1) * HW + (H1 - 1) * W + W1
    L2 = (G - 1) * HW + (H2 - 1) * W + W2
    L_sel = L2 - W - 1

    def mm(a, b):
        # bf16 MXU fast path on v5e/v6e/v7x when compute_dtype=bfloat16; the
        # casts are no-ops for the default f32 path.  f32 accumulation always.
        return jnp.dot(a.astype(compute_dtype), b.astype(compute_dtype),
                       preferred_element_type=jnp.float32)

    x = x_ref[...]                                        # (Cin_p, G*HW)

    # ---- conv1 + ReLU: single im2col matmul (contraction K*K*Cin_p) ----
    p1 = jnp.concatenate(
        [x[:, dy * W + dx: dy * W + dx + L1]
         for dy in range(K) for dx in range(K)], axis=0)  # (K*K*Cin_p, L1)
    y1 = jnp.maximum(mm(w1_ref[...], p1), 0.0)            # (Cmid_p, L1) f32

    # ---- conv2 + ReLU: single im2col matmul (contraction K*K*Cmid_p) ----
    p2 = jnp.concatenate(
        [y1[:, dy * W + dx: dy * W + dx + L2]
         for dy in range(K) for dx in range(K)], axis=0)  # (K*K*Cmid_p, L2)
    y2 = jnp.maximum(mm(w2_ref[...], p2), 0.0)            # (Cout, L2) f32

    # ---- 2x2 max-pool ----
    # Row-pair max then col-pair max: two full-vector VPU passes over ~8 vregs
    # (the odd-position maxima are a negligible amount of wasted VPU work).
    hm = jnp.maximum(y2[:, :L2 - W], y2[:, W:])           # (Cout, L2-W)
    cm = jnp.maximum(hm[:, :L_sel], hm[:, 1:L_sel + 1])   # (Cout, L_sel)

    # Gather the even-(h,w) window maxima with a 0/1 selection matmul: the MXU
    # does the lane compaction and the result is written with ONE wide store.
    # TODO(synk): at real UNet sizes L_sel is large -- build the selector per
    # output-row strip (or use strided stores) instead of one (L_sel, OUT) mask.
    out_w = sel_ref.shape[1]
    rows = lax.broadcasted_iota(jnp.int32, (L_sel, out_w), 0)
    sel = (rows == sel_ref[...]).astype(jnp.float32)      # (L_sel, G*Hp*Wp)
    o_ref[...] = jnp.dot(cm, sel,
                         preferred_element_type=jnp.float32).astype(o_ref.dtype)


def _pad_to_multiple(a, axis, mult):
    pad = (-a.shape[axis]) % mult
    if pad == 0:
        return a
    widths = [(0, 0)] * a.ndim
    widths[axis] = (0, pad)
    return jnp.pad(a, widths)


def _im2col_weight(w_oihw, cin_padded):
    """OIHW -> (O, K*K*cin_padded), tap-major / channel-minor columns (zeros in pads)."""
    O, I, KH, KW = w_oihw.shape
    w = jnp.transpose(w_oihw, (0, 2, 3, 1)).astype(jnp.float32)   # (O, KH, KW, I)
    if cin_padded > I:
        w = jnp.pad(w, ((0, 0), (0, 0), (0, 0), (0, cin_padded - I)))
    return w.reshape(O, KH * KW * cin_padded)


def down_forward(x_nchw, w1_oihw, w2_oihw, *, compute_dtype=jnp.float32,
                 imgs_per_step=None):
    """Forward pass of `Down` (NCHW in / NCHW out); compute done in one Pallas kernel."""
    N, Cin, H, W = x_nchw.shape
    Cmid = w1_oihw.shape[0]
    Cout = w2_oihw.shape[0]
    H1, W1 = H - (K - 1), W - (K - 1)
    H2, W2 = H1 - (K - 1), W1 - (K - 1)
    # TODO(synk): PyTorch MaxPool2d floors odd extents; this path assumes even
    # conv-output dims (true for standard UNet sizes) rather than masking a tail.
    assert H2 % POOL == 0 and W2 % POOL == 0
    Hp, Wp = H2 // POOL, W2 // POOL
    HW = H * W

    # Pad channel axes to the sublane tile so the in-kernel im2col concats land
    # on 8-row boundaries; padded channels are exactly zero -> result is exact.
    Cin_p = Cin + (-Cin) % SUBLANE
    Cmid_p = Cmid + (-Cmid) % SUBLANE

    # Images per grid step: >=512 flat pixels to amortize the ~0.35us per-step
    # overhead.  At real UNet sizes H*W >> 512 so this is 1 image/step and
    # grid=(N,): the "parallel" axis then also load-balances v7x's two
    # TensorCores.  If a single image's intermediates exceed VMEM there
    # (64 MiB on v7x), strip-tile rows with a (K-1)-row halo, size strips to
    # ~24-28 MiB, and on v5e consider pipeline_mode=pl.Buffered(3) on the x
    # strips to cover its lower HBM bandwidth.
    if imgs_per_step is None:
        imgs_per_step = min(N, max(1, -(-512 // HW)))
    while N % imgs_per_step:
        imgs_per_step -= 1
    G = imgs_per_step
    num_steps = N // G
    if num_steps > 1 and (G * HW) % 128 != 0:
        G, num_steps = N, 1          # keep every lane-axis block 128-aligned

    # Layout plumbing (in a real net keep activations in this layout across
    # layers and reshape weights once at init, not per call):
    #   NCHW -> (Cin_p, N*H*W): channels on sublanes, flat (n,h,w) on lanes.
    x = jnp.transpose(x_nchw, (1, 0, 2, 3)).reshape(Cin, N * HW).astype(jnp.float32)
    x = _pad_to_multiple(x, 0, SUBLANE)                      # (Cin_p, N*HW)
    w1m = _im2col_weight(w1_oihw, Cin_p)                     # (Cmid, 9*Cin_p)
    w1m = _pad_to_multiple(w1m, 0, SUBLANE)                  # (Cmid_p, 9*Cin_p)
    w2m = _im2col_weight(w2_oihw, Cmid_p)                    # (Cout, 9*Cmid_p)

    # Flat position (within a G-image slab) of each pooled output's 2x2 window.
    gg, ii, jj = np.meshgrid(np.arange(G), np.arange(Hp), np.arange(Wp), indexing="ij")
    sel = jnp.asarray((gg * HW + POOL * ii * W + POOL * jj)
                      .reshape(1, G * Hp * Wp).astype(np.int32))

    out = pl.pallas_call(
        partial(down_kernel, H, W, G, compute_dtype),
        out_shape=jax.ShapeDtypeStruct((num_steps, Cout, G * Hp * Wp), jnp.float32),
        grid=(num_steps,),
        in_specs=[
            pl.BlockSpec((Cin_p, G * HW), lambda s: (0, s)),
            pl.BlockSpec((Cmid_p, K * K * Cin_p), lambda s: (0, 0)),
            pl.BlockSpec((Cout, K * K * Cmid_p), lambda s: (0, 0)),
            pl.BlockSpec((1, G * Hp * Wp), lambda s: (0, 0)),
        ],
        out_specs=pl.BlockSpec((None, Cout, G * Hp * Wp), lambda s: (s, 0, 0)),
        compiler_params=pltpu.CompilerParams(
            dimension_semantics=("parallel",),
            vmem_limit_bytes=32 * 1024 * 1024),
    )(x, w1m, w2m, sel)

    # (num_steps, Cout, G*Hp*Wp) -> NCHW (pure layout plumbing).
    out = out.reshape(num_steps, Cout, G, Hp, Wp)
    return jnp.transpose(out, (0, 2, 1, 3, 4)).reshape(N, Cout, Hp, Wp)


def down_reference(x_nchw, w1_oihw, w2_oihw):
    """Pure-JAX reference matching PyTorch semantics exactly."""
    dn = ("NCHW", "OIHW", "NCHW")
    y = lax.conv_general_dilated(x_nchw, w1_oihw, (1, 1), "VALID", dimension_numbers=dn)
    y = jnp.maximum(y, 0.0)
    y = lax.conv_general_dilated(y, w2_oihw, (1, 1), "VALID", dimension_numbers=dn)
    y = jnp.maximum(y, 0.0)
    return lax.reduce_window(y, -jnp.inf, lax.max,
                             window_dimensions=(1, 1, POOL, POOL),
                             window_strides=(1, 1, POOL, POOL), padding="VALID")


if __name__ == "__main__":
    # Down(in_channels=4, out_channels=8) on a (2, 4, 16, 16) NCHW input.
    N, Cin, Cout, H, W = 2, 4, 8, 16, 16
    Cmid = Cout  # DoubleConv: mid_channels defaults to out_channels

    key = jax.random.PRNGKey(0)
    k1, k2, k3 = jax.random.split(key, 3)
    x = jax.random.normal(k1, (N, Cin, H, W), jnp.float32)
    # Deterministic synthetic weights (Conv2d has bias=False in the module).
    w1 = 0.2 * jax.random.normal(k2, (Cmid, Cin, K, K), jnp.float32)   # conv1 OIHW
    w2 = 0.2 * jax.random.normal(k3, (Cout, Cmid, K, K), jnp.float32)  # conv2 OIHW

    out = jax.block_until_ready(down_forward(x, w1, w2))   # f32 path (PyTorch-exact)

    ref = down_reference(x, w1, w2)
    assert out.shape == (N, Cout, (H - 4) // POOL, (W - 4) // POOL), out.shape
    err = float(jnp.max(jnp.abs(out - ref)))
    assert jnp.allclose(out, ref, atol=1e-4, rtol=1e-4), err
    print("KERNEL_OK")
</pallas_src>

<mosaic_0001>
module attributes {stable_mosaic.version = 11 : i64} {
  func.func @down_kernel(%arg0: i32, %arg1: memref<8x512xf32, #tpu.memory_space<vmem>>, %arg2: memref<8x72xf32, #tpu.memory_space<vmem>>, %arg3: memref<8x72xf32, #tpu.memory_space<vmem>>, %arg4: memref<1x72xi32, #tpu.memory_space<vmem>>, %arg5: memref<1x8x72xf32, #tpu.memory_space<vmem>>) attributes {dimension_semantics = [#tpu.dimension_semantics<parallel>], iteration_bounds = array<i64: 1>, scalar_prefetch = 0 : i64, scratch_operands = 0 : i64, tpu.core_type = #tpu.core_type<tc>, window_params = [{transform_indices = @transform_0, window_bounds = array<i64: 8, 512>}, {pipeline_mode = #tpu.pipeline_mode<synchronous>, transform_indices = @transform_1, window_bounds = array<i64: 8, 72>}, {pipeline_mode = #tpu.pipeline_mode<synchronous>, transform_indices = @transform_2, window_bounds = array<i64: 8, 72>}, {pipeline_mode = #tpu.pipeline_mode<synchronous>, transform_indices = @transform_3, window_bounds = array<i64: 1, 72>}, {transform_indices = @transform_4, window_bounds = array<i64: 1, 8, 72>}]} {
    %c0 = arith.constant 0 : index
    %c0_0 = arith.constant 0 : index
    %0 = vector.load %arg1[%c0, %c0_0] : memref<8x512xf32, #tpu.memory_space<vmem>>, vector<8x512xf32>
    %1 = vector.extract_strided_slice %0 {offsets = [0, 0], sizes = [8, 478], strides = [1, 1]} : vector<8x512xf32> to vector<8x478xf32>
    %2 = vector.extract_strided_slice %0 {offsets = [0, 1], sizes = [8, 478], strides = [1, 1]} : vector<8x512xf32> to vector<8x478xf32>
    %3 = vector.extract_strided_slice %0 {offsets = [0, 2], sizes = [8, 478], strides = [1, 1]} : vector<8x512xf32> to vector<8x478xf32>
    %4 = vector.extract_strided_slice %0 {offsets = [0, 16], sizes = [8, 478], strides = [1, 1]} : vector<8x512xf32> to vector<8x478xf32>
    %5 = vector.extract_strided_slice %0 {offsets = [0, 17], sizes = [8, 478], strides = [1, 1]} : vector<8x512xf32> to vector<8x478xf32>
    %6 = vector.extract_strided_slice %0 {offsets = [0, 18], sizes = [8, 478], strides = [1, 1]} : vector<8x512xf32> to vector<8x478xf32>
    %7 = vector.extract_strided_slice %0 {offsets = [0, 32], sizes = [8, 478], strides = [1, 1]} : vector<8x512xf32> to vector<8x478xf32>
    %8 = vector.extract_strided_slice %0 {offsets = [0, 33], sizes = [8, 478], strides = [1, 1]} : vector<8x512xf32> to vector<8x478xf32>
    %9 = vector.extract_strided_slice %0 {offsets = [0, 34], sizes = [8, 478], strides = [1, 1]} : vector<8x512xf32> to vector<8x478xf32>
    %10 = tpu.concatenate %1, %2, %3, %4, %5, %6, %7, %8, %9 in 0 : vector<8x478xf32>, vector<8x478xf32>, vector<8x478xf32>, vector<8x478xf32>, vector<8x478xf32>, vector<8x478xf32>, vector<8x478xf32>, vector<8x478xf32>, vector<8x478xf32> -> vector<72x478xf32>
    %c0_1 = arith.constant 0 : index
    %c0_2 = arith.constant 0 : index
    %11 = vector.load %arg2[%c0_1, %c0_2] : memref<8x72xf32, #tpu.memory_space<vmem>>, vector<8x72xf32>
    %cst = arith.constant dense<0.000000e+00> : vector<8x478xf32>
    %12 = tpu.matmul %11, %10, %cst {dimension_numbers = #tpu.dot_dimension_numbers<[1], [0], [0], [1], [0, 0, 1, 1], [], []>} : vector<8x72xf32>, vector<72x478xf32>, vector<8x478xf32> -> vector<8x478xf32>
    %cst_3 = arith.constant 0.000000e+00 : f32
    %13 = vector.broadcast %cst_3 : f32 to vector<8x478xf32>
    %14 = arith.maximumf %12, %13 : vector<8x478xf32>
    %15 = vector.extract_strided_slice %14 {offsets = [0, 0], sizes = [8, 444], strides = [1, 1]} : vector<8x478xf32> to vector<8x444xf32>
    %16 = vector.extract_strided_slice %14 {offsets = [0, 1], sizes = [8, 444], strides = [1, 1]} : vector<8x478xf32> to vector<8x444xf32>
    %17 = vector.extract_strided_slice %14 {offsets = [0, 2], sizes = [8, 444], strides = [1, 1]} : vector<8x478xf32> to vector<8x444xf32>
    %18 = vector.extract_strided_slice %14 {offsets = [0, 16], sizes = [8, 444], strides = [1, 1]} : vector<8x478xf32> to vector<8x444xf32>
    %19 = vector.extract_strided_slice %14 {offsets = [0, 17], sizes = [8, 444], strides = [1, 1]} : vector<8x478xf32> to vector<8x444xf32>
    %20 = vector.extract_strided_slice %14 {offsets = [0, 18], sizes = [8, 444], strides = [1, 1]} : vector<8x478xf32> to vector<8x444xf32>
    %21 = vector.extract_strided_slice %14 {offsets = [0, 32], sizes = [8, 444], strides = [1, 1]} : vector<8x478xf32> to vector<8x444xf32>
    %22 = vector.extract_strided_slice %14 {offsets = [0, 33], sizes = [8, 444], strides = [1, 1]} : vector<8x478xf32> to vector<8x444xf32>
    %23 = vector.extract_strided_slice %14 {offsets = [0, 34], sizes = [8, 444], strides = [1, 1]} : vector<8x478xf32> to vector<8x444xf32>
    %24 = tpu.concatenate %15, %16, %17, %18, %19, %20, %21, %22, %23 in 0 : vector<8x444xf32>, vector<8x444xf32>, vector<8x444xf32>, vector<8x444xf32>, vector<8x444xf32>, vector<8x444xf32>, vector<8x444xf32>, vector<8x444xf32>, vector<8x444xf32> -> vector<72x444xf32>
    %c0_4 = arith.constant 0 : index
    %c0_5 = arith.constant 0 : index
    %25 = vector.load %arg3[%c0_4, %c0_5] : memref<8x72xf32, #tpu.memory_space<vmem>>, vector<8x72xf32>
    %cst_6 = arith.constant dense<0.000000e+00> : vector<8x444xf32>
    %26 = tpu.matmul %25, %24, %cst_6 {dimension_numbers = #tpu.dot_dimension_numbers<[1], [0], [0], [1], [0, 0, 1, 1], [], []>} : vector<8x72xf32>, vector<72x444xf32>, vector<8x444xf32> -> vector<8x444xf32>
    %cst_7 = arith.constant 0.000000e+00 : f32
    %27 = vector.broadcast %cst_7 : f32 to vector<8x444xf32>
    %28 = arith.maximumf %26, %27 : vector<8x444xf32>
    %29 = vector.extract_strided_slice %28 {offsets = [0, 0], sizes = [8, 428], strides = [1, 1]} : vector<8x444xf32> to vector<8x428xf32>
    %30 = vector.extract_strided_slice %28 {offsets = [0, 16], sizes = [8, 428], strides = [1, 1]} : vector<8x444xf32> to vector<8x428xf32>
    %31 = arith.maximumf %29, %30 : vector<8x428xf32>
    %32 = vector.extract_strided_slice %31 {offsets = [0, 0], sizes = [8, 427], strides = [1, 1]} : vector<8x428xf32> to vector<8x427xf32>
    %33 = vector.extract_strided_slice %31 {offsets = [0, 1], sizes = [8, 427], strides = [1, 1]} : vector<8x428xf32> to vector<8x427xf32>
    %34 = arith.maximumf %32, %33 : vector<8x427xf32>
    %35 = tpu.iota {dimensions = array<i32: 0>} : vector<427x72xi32>
    %c0_8 = arith.constant 0 : index
    %c0_9 = arith.constant 0 : index
    %36 = vector.load %arg4[%c0_8, %c0_9] : memref<1x72xi32, #tpu.memory_space<vmem>>, vector<1x72xi32>
    %37 = vector.broadcast %36 : vector<1x72xi32> to vector<427x72xi32>
    %38 = arith.cmpi eq, %35, %37 : vector<427x72xi32>
    %39 = arith.extui %38 : vector<427x72xi1> to vector<427x72xi32>
    %40 = arith.sitofp %39 : vector<427x72xi32> to vector<427x72xf32>
    %cst_10 = arith.constant dense<0.000000e+00> : vector<8x72xf32>
    %41 = tpu.matmul %34, %40, %cst_10 {dimension_numbers = #tpu.dot_dimension_numbers<[1], [0], [0], [1], [0, 0, 1, 1], [], []>} : vector<8x427xf32>, vector<427x72xf32>, vector<8x72xf32> -> vector<8x72xf32>
    %c0_11 = arith.constant 0 : index
    %c0_12 = arith.constant 0 : index
    %c0_13 = arith.constant 0 : index
    %42 = vector.load %arg5[%c0_11, %c0_12, %c0_13] : memref<1x8x72xf32, #tpu.memory_space<vmem>>, vector<1x8x72xf32>
    %43 = vector.shape_cast %42 : vector<1x8x72xf32> to vector<8x72xf32>
    %44 = vector.shape_cast %41 : vector<8x72xf32> to vector<1x8x72xf32>
    tpu.vector_store %arg5[%c0_11, %c0_12, %c0_13], %44 {strides = array<i32>} : memref<1x8x72xf32, #tpu.memory_space<vmem>>, vector<1x8x72xf32>,
    return
  }
  func.func @transform_0(%arg0: i32) -> (i32, i32) {
    %c0_i32 = arith.constant 0 : i32
    %c0_i32_0 = arith.constant 0 : i32
    return %c0_i32, %arg0 : i32, i32
  }
  func.func @transform_1(%arg0: i32) -> (i32, i32) {
    %c0_i32 = arith.constant 0 : i32
    %c0_i32_0 = arith.constant 0 : i32
    %c0_i32_1 = arith.constant 0 : i32
    return %c0_i32, %c0_i32_0 : i32, i32
  }
  func.func @transform_2(%arg0: i32) -> (i32, i32) {
    %c0_i32 = arith.constant 0 : i32
    %c0_i32_0 = arith.constant 0 : i32
    %c0_i32_1 = arith.constant 0 : i32
    return %c0_i32, %c0_i32_0 : i32, i32
  }
  func.func @transform_3(%arg0: i32) -> (i32, i32) {
    %c0_i32 = arith.constant 0 : i32
    %c0_i32_0 = arith.constant 0 : i32
    %c0_i32_1 = arith.constant 0 : i32
    return %c0_i32, %c0_i32_0 : i32, i32
  }
  func.func @transform_4(%arg0: i32) -> (i32, i32, i32) {
    %c0_i32 = arith.constant 0 : i32
    %c0_i32_0 = arith.constant 0 : i32
    %c0_i32_1 = arith.constant 0 : i32
    return %arg0, %c0_i32, %c0_i32_0 : i32, i32, i32
  }
}

</mosaic_0001>

<bundles_post_ra>
// kernel: tpu_custom_call.1
= control target key start
LH: loop header
LB: loop body
LE: loop exit
PB: predicated region body
PF: predicated region fallthrough
CT: control target
= control target key end

     0   :  { %9 = vsyncpa [#allocation3], 0  ;;  %s2040_s0 = inlined_call_operand.hbm [shape: f32[8,512], index: 0, kind: input, shape index: {}]   ;;  %s2041_s1 = inlined_call_operand.hbm [shape: f32[8,72], index: 1, kind: input, shape index: {}]   ;;  %s2042_s2 = inlined_call_operand.hbm [shape: f32[8,72], index: 2, kind: input, shape index: {}]   ;;  %s2043_s3 = inlined_call_operand.vmem [shape: s32[1,72], index: 3, kind: input, shape index: {}]   ;;  %s2044_s4 = inlined_call_operand.hbm [shape: f32[1,8,72], index: 4, kind: output, shape index: {}]  }
   0x1   :  { %10 = vsyncpa [#allocation6], 0 }
   0x2   :  { %11 = vsyncpa [#allocation4], 0  ;;  %s1586_s15 = smov [#allocation5]   ;;  %s1587_s17 = smov [#allocation2]  }
   0x3   :  { %s28_s16 = sshll.u32 %s1586_s15, 4  ;;  %s18_s18 = sshll.u32 %s1587_s17, 4  ;;  %s29_s16 = int_to_ptr.vmem [resolvable:$true] %s28_s16  ;;  %s19_s18 = int_to_ptr.vmem [resolvable:$true] %s18_s18 }
   0x4   :  { %s1492_s21 = scalar_lea.hbm %s2041_s1, 128 }
   0x5   :  { %p1493_p0 = scmp.ne.s32.totalorder %s2041_s1, %s1492_s21  ;;  %p1496_p1 = scmp.lt.u32.totalorder %s1492_s21, %s2041_s1 }
   0x7   :  { %p1498_p2 = pnand %p1496_p1, %p1493_p0 }
   0x9   :  { %1501 = shalt.err (!%p1498_p2)
}
   0xa   :  { %s1502_s26 = scalar_lea.vmem %s29_s16, 128  ;;  %p1507_p4 = scmp.lt.s32.totalorder %s29_s16, %s29_s16 }
   0xb   :  { %p1503_p3 = scmp.ne.s32.totalorder %s29_s16, %s1502_s26  ;;  %p1508_p5 = scmp.lt.s32.totalorder %s1502_s26, %s1502_s26 }
   0xd   :  { %p1509_p6 = por %p1508_p5, %p1507_p4 }
   0xf   :  { %p1510_p7 = pnand %p1509_p6, %p1503_p3 }
  0x11   :  { %1513 = shalt.err (!%p1510_p7)
}
  0x12   :  { %31 = dma.hbm_to_vmem [thread:$0]  %s2041_s1, 128, %s29_s16, [#allocation6]  }
  0x13   :  { %s1514_s5 = scalar_lea.hbm %s2040_s0, 512 }
  0x14   :  { %p1515_p8 = scmp.ne.s32.totalorder %s2040_s0, %s1514_s5  ;;  %p1518_p9 = scmp.lt.u32.totalorder %s1514_s5, %s2040_s0 }
  0x16   :  { %p1520_p10 = pnand %p1518_p9, %p1515_p8 }
  0x18   :  { %1523 = shalt.err (!%p1520_p10)
}
  0x19   :  { %s1524_s10 = scalar_lea.vmem %s19_s18, 512  ;;  %p1529_p12 = scmp.lt.s32.totalorder %s19_s18, %s19_s18 }
  0x1a   :  { %p1525_p11 = scmp.ne.s32.totalorder %s19_s18, %s1524_s10  ;;  %p1530_p13 = scmp.lt.s32.totalorder %s1524_s10, %s1524_s10 }
  0x1c   :  { %p1531_p0 = por %p1530_p13, %p1529_p12 }
  0x1e   :  { %p1532_p1 = pnand %p1531_p0, %p1525_p11 }
  0x20   :  { %1535 = shalt.err (!%p1532_p1)
}
  0x21   :  { %21 = dma.hbm_to_vmem [thread:$0]  %s2040_s0, 512, %s19_s18, [#allocation3]  }
  0x22   :  { %s1588_s12 = smov [#allocation7]   ;;  %s1536_s16 = scalar_lea.hbm %s2042_s2, 128 }
  0x23   :  { %s38_s13 = sshll.u32 %s1588_s12, 4  ;;  %p1537_p2 = scmp.ne.s32.totalorder %s2042_s2, %s1536_s16  ;;  %s39_s13 = int_to_ptr.vmem [resolvable:$true] %s38_s13 }
  0x24   :  { %p1540_p3 = scmp.lt.u32.totalorder %s1536_s16, %s2042_s2 }
  0x26   :  { %p1542_p4 = pnand %p1540_p3, %p1537_p2 }
  0x28   :  { %1545 = shalt.err (!%p1542_p4)
}
  0x29   :  { %s1546_s22 = scalar_lea.vmem %s39_s13, 128  ;;  %p1551_p6 = scmp.lt.s32.totalorder %s39_s13, %s39_s13 }
  0x2a   :  { %p1547_p5 = scmp.ne.s32.totalorder %s39_s13, %s1546_s22  ;;  %p1552_p7 = scmp.lt.s32.totalorder %s1546_s22, %s1546_s22 }
  0x2c   :  { %p1553_p8 = por %p1552_p7, %p1551_p6 }
  0x2e   :  { %p1554_p9 = pnand %p1553_p8, %p1547_p5 }
  0x30   :  { %1557 = shalt.err (!%p1554_p9)
}
  0x31   :  { %41 = dma.hbm_to_vmem [thread:$0]  %s2042_s2, 128, %s39_s13, [#allocation6]  }
  0x32   :  { %1580 = dma.done.wait [#allocation3], 512  }
  0x33   :  { %1581 = vsyncadd [#allocation3], 4294966784 }
  0x34   :  { %1582 = dma.done.wait [#allocation6], 256  }
  0x35   :  { %1583 = vsyncadd [#allocation6], 4294967040  ;;  %v54_v0 = vld [vmem:[#allocation2 + $0x8] sm:$0xff]  ;;  %v1663_v1 = vld [vmem:[#allocation2 + $0x10] sm:$0xff]  ;;  %s1589_s23 = smov 126   ;;  %s1590_s24 = smov 127  }
  0x36   :  { %v1352_v2 = vpack.i.bf16 %v1663_v1, %v54_v0  ;;  %v1666_v3 = vld [vmem:[#allocation2] sm:$0xff]  ;;  %v56_v4 = vld [vmem:[#allocation2 + $0x18] sm:$0xff]  ;;  %s1591_s2 = smov 112   ;;  %s1592_s25 = smov 110   ;;  %v1596_v6 = vmov 0.0   ;;  %vm69_vm0 = vcmask 1039360  }
  0x37   :  { %v1347_v5 = vpack.i.bf16 %v56_v4, %v1666_v3  ;;  %s1593_s26 = smov 111   ;;  %s1594_s27 = smov 95   ;;  %258 = vmatprep.mubr.f32.mxu0 %v1596_v6  ;;  %329 = vmatprep.mubr.f32.mxu1 %v1596_v6  ;;  %vm85_vm1 = vcmask 1031168   ;;  %vm101_vm2 = vcmask 916480   ;;  %vm117_vm3 = vcmask 908288  }
  0x38   :  { %1353 = vrot.lane.b32.xlu1 %v1352_v2, %s1589_s23  ;;  %1343 = vrot.lane.b32.xlu0 %v1352_v2, %s1590_s24  ;;  %s1595_s28 = smov 96   ;;  %s1597_s29 = smov 94   ;;  %vm133_vm4 = vcmask 900096   ;;  %vm149_vm5 = vcmask 785408   ;;  %vm165_vm6 = vcmask 777216   ;;  %vm181_vm7 = vcmask 769024  }
  0x39   :  { %vm2045_vm8 = vcmask 588800  }
  0x3c   :  { %1358 = vrot.lane.b32.xlu1 %v1352_v2, %s1591_s2  ;;  %1348 = vrot.lane.b32.xlu0 %v1347_v5, %s1590_s24 }
  0x40   :  { %1368 = vrot.lane.b32.xlu1 %v1347_v5, %s1591_s2  ;;  %1363 = vrot.lane.b32.xlu0 %v1347_v5, %s1589_s23 }
  0x44   :  { %1378 = vrot.lane.b32.xlu1 %v1352_v2, %s1592_s25  ;;  %1373 = vrot.lane.b32.xlu0 %v1352_v2, %s1593_s26 }
  0x48   :  { %1388 = vrot.lane.b32.xlu1 %v1347_v5, %s1592_s25  ;;  %1383 = vrot.lane.b32.xlu0 %v1347_v5, %s1593_s26 }
  0x4c   :  { %1398 = vrot.lane.b32.xlu1 %v1352_v2, %s1594_s27  ;;  %1393 = vrot.lane.b32.xlu0 %v1352_v2, %s1595_s28 }
  0x50   :  { %1408 = vrot.lane.b32.xlu1 %v1347_v5, %s1594_s27  ;;  %1403 = vrot.lane.b32.xlu0 %v1347_v5, %s1595_s28 }
  0x54   :  { %177 = vrot.lane.b32.xlu1 %v1663_v1, %s1597_s29  ;;  %175 = vrot.lane.b32.xlu0 %v54_v0, %s1597_s29 }
  0x58   :  { %179 = vrot.lane.b32.xlu1 %v56_v4, %s1597_s29  ;;  %173 = vrot.lane.b32.xlu0 %v1666_v3, %s1597_s29 }
  0xaa   :  { %v1354_v7 = vpop.permute.xlu1 %1353  ;;  %v1344_v8 = vpop.permute.xlu0 %1343 }
  0xab   :  { %v1346_v9 = vunpack.i.h.bf16 %v1344_v8  ;;  %v1345_v10 = vunpack.i.l.bf16 %v1344_v8  ;;  %v1356_v11 = vunpack.i.h.bf16 %v1354_v7  ;;  %v1355_v12 = vunpack.i.l.bf16 %v1354_v7 }
  0xad   :  { %v71_v13 = vsel %vm69_vm0, %v1345_v10, %v1346_v9  ;;  %v87_v21 = vsel %vm85_vm1, %v1355_v12, %v1356_v11 }
  0xae   :  { %v1359_v14 = vpop.permute.xlu1 %1358  ;;  %v1349_v15 = vpop.permute.xlu0 %1348  ;;  %v1196_v16 = vpack.c.bf16 %v71_v13, %v54_v0 }
  0xaf   :  { %v1361_v17 = vunpack.i.h.bf16 %v1359_v14  ;;  %v1360_v18 = vunpack.i.l.bf16 %v1359_v14  ;;  %v1351_v19 = vunpack.i.h.bf16 %v1349_v15  ;;  %v1350_v20 = vunpack.i.l.bf16 %v1349_v15 }
  0xb0   :  { %1197 = vmatprep.subr.bf16.mxu0 %v1196_v16 }
  0xb1   :  { %v1212_v22 = vpack.c.bf16 %v1351_v19, %v56_v4  ;;  %v70_v23 = vsel %vm69_vm0, %v1350_v20, %v1345_v10  ;;  %v72_v24 = vsel %vm69_vm0, %v1346_v9, %v1351_v19  ;;  %v103_v25 = vsel %vm101_vm2, %v1360_v18, %v1361_v17 }
  0xb2   :  { %v1369_v26 = vpop.permute.xlu1 %1368  ;;  %v1364_v27 = vpop.permute.xlu0 %1363  ;;  %v1198_v28 = vpack.c.bf16 %v70_v23, %v1666_v3  ;;  %v1214_v29 = vpack.c.bf16 %v72_v24, %v1663_v1  ;;  %v1200_v30 = vpack.c.bf16 %v103_v25, %v87_v21 }
  0xb3   :  { %v1371_v31 = vunpack.i.h.bf16 %v1369_v26  ;;  %v1370_v32 = vunpack.i.l.bf16 %v1369_v26  ;;  %v1366_v33 = vunpack.i.h.bf16 %v1364_v27  ;;  %v1365_v34 = vunpack.i.l.bf16 %v1364_v27  ;;  %1213 = vmatprep.subr.bf16.mxu1 %v1212_v22 }
  0xb4   :  { %1199 = vmatpush1.bf16.msra.mxu0 %v1198_v28  ;;  %1215 = vmatpush1.bf16.msra.mxu1 %v1214_v29  ;;  %v189_v28 = vld [vmem:[#allocation5] sm:$0xff] }
  0xb5   :  { %v1216_v35 = vpack.c.bf16 %v1371_v31, %v1366_v33  ;;  %1201 = vmatprep.subr.bf16.mxu0 %v1200_v30  ;;  %v86_v36 = vsel %vm85_vm1, %v1365_v34, %v1355_v12  ;;  %v102_v37 = vsel %vm101_vm2, %v1370_v32, %v1360_v18  ;;  %v88_v38 = vsel %vm85_vm1, %v1356_v11, %v1366_v33 }
  0xb6   :  { %v1379_v39 = vpop.permute.xlu1 %1378  ;;  %v1374_v40 = vpop.permute.xlu0 %1373  ;;  %v1202_v41 = vpack.c.bf16 %v102_v37, %v86_v36  ;;  %v104_v42 = vsel %vm101_vm2, %v1361_v17, %v1371_v31 }
  0xb7   :  { %v1381_v43 = vunpack.i.h.bf16 %v1379_v39  ;;  %v1380_v44 = vunpack.i.l.bf16 %v1379_v39  ;;  %v1376_v45 = vunpack.i.h.bf16 %v1374_v40  ;;  %v1375_v46 = vunpack.i.l.bf16 %v1374_v40  ;;  %1217 = vmatprep.subr.bf16.mxu1 %v1216_v35 }
  0xb8   :  { %1203 = vmatpush1.bf16.msra.mxu0 %v1202_v41  ;;  %v1218_v47 = vpack.c.bf16 %v104_v42, %v88_v38 }
  0xb9   :  { %v119_v48 = vsel %vm117_vm3, %v1375_v46, %v1376_v45  ;;  %v135_v49 = vsel %vm133_vm4, %v1380_v44, %v1381_v43 }
  0xba   :  { %1219 = vmatpush1.bf16.msra.mxu1 %v1218_v47  ;;  %v1389_v50 = vpop.permute.xlu1 %1388  ;;  %v1384_v51 = vpop.permute.xlu0 %1383  ;;  %v1204_v52 = vpack.c.bf16 %v135_v49, %v119_v48 }
  0xbb   :  { %v1391_v53 = vunpack.i.h.bf16 %v1389_v50  ;;  %v1390_v54 = vunpack.i.l.bf16 %v1389_v50  ;;  %v1386_v55 = vunpack.i.h.bf16 %v1384_v51  ;;  %v1385_v56 = vunpack.i.l.bf16 %v1384_v51 }
  0xbc   :  { %1205 = vmatprep.subr.bf16.mxu0 %v1204_v52 }
  0xbd   :  { %v1220_v57 = vpack.c.bf16 %v1391_v53, %v1386_v55  ;;  %v118_v58 = vsel %vm117_vm3, %v1385_v56, %v1375_v46  ;;  %v134_v59 = vsel %vm133_vm4, %v1390_v54, %v1380_v44  ;;  %v120_v60 = vsel %vm117_vm3, %v1376_v45, %v1386_v55 }
  0xbe   :  { %v1399_v61 = vpop.permute.xlu1 %1398  ;;  %v1394_v62 = vpop.permute.xlu0 %1393  ;;  %v1206_v63 = vpack.c.bf16 %v134_v59, %v118_v58  ;;  %v136_v0 = vsel %vm133_vm4, %v1381_v43, %v1391_v53 }
  0xbf   :  { %v1401_v1 = vunpack.i.h.bf16 %v1399_v61  ;;  %v1400_v2 = vunpack.i.l.bf16 %v1399_v61  ;;  %v1396_v3 = vunpack.i.h.bf16 %v1394_v62  ;;  %v1395_v4 = vunpack.i.l.bf16 %v1394_v62  ;;  %1221 = vmatprep.subr.bf16.mxu1 %v1220_v57 }
  0xc0   :  { %1207 = vmatpush1.bf16.msra.mxu0 %v1206_v63  ;;  %v1222_v5 = vpack.c.bf16 %v136_v0, %v120_v60 }
  0xc1   :  { %v151_v7 = vsel %vm149_vm5, %v1395_v4, %v1396_v3  ;;  %v167_v8 = vsel %vm165_vm6, %v1400_v2, %v1401_v1 }
  0xc2   :  { %1223 = vmatpush1.bf16.msra.mxu1 %v1222_v5  ;;  %v1409_v9 = vpop.permute.xlu1 %1408  ;;  %v1404_v10 = vpop.permute.xlu0 %1403  ;;  %v1208_v11 = vpack.c.bf16 %v167_v8, %v151_v7 }
  0xc3   :  { %v1411_v12 = vunpack.i.h.bf16 %v1409_v9  ;;  %v1410_v13 = vunpack.i.l.bf16 %v1409_v9  ;;  %v1406_v14 = vunpack.i.h.bf16 %v1404_v10  ;;  %v1405_v15 = vunpack.i.l.bf16 %v1404_v10 }
  0xc4   :  { %1209 = vmatprep.subr.bf16.mxu0 %v1208_v11 }
  0xc5   :  { %v1224_v16 = vpack.c.bf16 %v1411_v12, %v1406_v14  ;;  %v150_v17 = vsel %vm149_vm5, %v1405_v15, %v1395_v4  ;;  %v166_v18 = vsel %vm165_vm6, %v1410_v13, %v1400_v2  ;;  %v152_v19 = vsel %vm149_vm5, %v1396_v3, %v1406_v14 }
  0xc6   :  { %v178_v20 = vpop.permute.xlu1 %177  ;;  %v176_v21 = vpop.permute.xlu0 %175  ;;  %v1210_v22 = vpack.c.bf16 %v166_v18, %v150_v17  ;;  %v168_v23 = vsel %vm165_vm6, %v1401_v1, %v1411_v12 }
  0xc7   :  { %1225 = vmatprep.subr.bf16.mxu1 %v1224_v16  ;;  %v1226_v24 = vpack.c.bf16 %v168_v23, %v152_v19  ;;  %v183_v25 = vsel %vm181_vm7, %v176_v21, %v178_v20 }
  0xc8   :  { %1211 = vmatpush1.bf16.msra.mxu0 %v1210_v22 }
  0xc9   :  { %1227 = vmatpush1.bf16.msra.mxu1 %v1226_v24  ;;  %210 = vmatprep.subr.mxu0 %v183_v25 }
  0xca   :  { %v180_v26 = vpop.permute.xlu1 %179  ;;  %v174_v27 = vpop.permute.xlu0 %173 }
  0xcb   :  { %281 = vmatprep.subr.mxu1 %v180_v26  ;;  %v182_v29 = vsel %vm181_vm7, %v174_v27, %v176_v21  ;;  %v184_v30 = vsel %vm181_vm7, %v178_v20, %v180_v26 }
  0xcc   :  { %211 = vmatpush1.msra.mxu0 %v182_v29 }
  0xcd   :  { %282 = vmatpush1.msra.mxu1 %v184_v30  ;;  %1047 = vmatmul.mubr.msk.f32.vlgmr.msra.gmra.mrb[0].mxu0 %vm2045_vm8, %v189_v28 }
  0xce   :  { %1048 = vmatmul.mubr.msk.f32.vlgmr.msra.gmra.mrb[0].mxu1 %vm2045_vm8, %v189_v28  ;;  %532 = vmatprep.mubr.f32.mxu0 %v1596_v6 }
  0xcf   :  { %603 = vmatprep.mubr.f32.mxu1 %v1596_v6 }
 0x1a0   :  { %v260_v31 = vpop.f32.mrb[0].mxu0 }
 0x1a1   :  { %v1721_v32 = vmax.f32 %v260_v31, 0.0  ;;  %v331_v33 = vpop.f32.mrb[0].mxu1  ;;  %v262_v34 = vpop.f32.mrb[1].mxu0 }
 0x1a2   :  { %v333_v35 = vpop.f32.mrb[1].mxu1  ;;  %v338_v38 = vmax.f32 %v331_v33, 0.0  ;;  %v337_v39 = vmax.f32 %v262_v34, 0.0 }
 0x1a3   :  { %v339_v36 = vmax.f32 %v333_v35, 0.0 }
 0x1a4   :  { %v1447_v40 = vpack.i.bf16 %v338_v38, %v337_v39 }
 0x1a5   :  { %v1417_v37 = vpack.i.bf16 %v339_v36, %v1721_v32 }
 0x1a7   :  { %1418 = vrot.lane.b32.xlu0 %v1417_v37, %s1589_s23  ;;  %1413 = vrot.lane.b32.xlu1 %v1417_v37, %s1590_s24 }
 0x1ab   :  { %1428 = vrot.lane.b32.xlu0 %v1417_v37, %s1593_s26  ;;  %1423 = vrot.lane.b32.xlu1 %v1417_v37, %s1591_s2 }
 0x1af   :  { %1438 = vrot.lane.b32.xlu0 %v1417_v37, %s1595_s28  ;;  %1433 = vrot.lane.b32.xlu1 %v1417_v37, %s1592_s25 }
 0x1b3   :  { %1443 = vrot.lane.b32.xlu1 %v1417_v37, %s1594_s27  ;;  %1448 = vrot.lane.b32.xlu0 %v1447_v40, %s1590_s24 }
 0x1b7   :  { %1458 = vrot.lane.b32.xlu1 %v1447_v40, %s1591_s2  ;;  %1453 = vrot.lane.b32.xlu0 %v1447_v40, %s1589_s23 }
 0x1bb   :  { %1468 = vrot.lane.b32.xlu1 %v1447_v40, %s1592_s25  ;;  %1463 = vrot.lane.b32.xlu0 %v1447_v40, %s1593_s26 }
 0x1bf   :  { %1478 = vrot.lane.b32.xlu1 %v1447_v40, %s1594_s27  ;;  %1473 = vrot.lane.b32.xlu0 %v1447_v40, %s1595_s28 }
 0x1c3   :  { %453 = vrot.lane.b32.xlu1 %v338_v38, %s1597_s29  ;;  %451 = vrot.lane.b32.xlu0 %v337_v39, %s1597_s29 }
 0x1c7   :  { %455 = vrot.lane.b32.xlu1 %v339_v36, %s1597_s29  ;;  %449 = vrot.lane.b32.xlu0 %v1721_v32, %s1597_s29 }
 0x219   :  { %v1419_v41 = vpop.permute.xlu0 %1418  ;;  %v1414_v42 = vpop.permute.xlu1 %1413 }
 0x21a   :  { %v1416_v43 = vunpack.i.h.bf16 %v1414_v42  ;;  %v1421_v52 = vunpack.i.h.bf16 %v1419_v41  ;;  %v1415_v53 = vunpack.i.l.bf16 %v1414_v42  ;;  %v1420_v56 = vunpack.i.l.bf16 %v1419_v41 }
 0x21c   :  { %v1244_v44 = vpack.c.bf16 %v1416_v43, %v339_v36 }
 0x21d   :  { %v1429_v45 = vpop.permute.xlu0 %1428  ;;  %v1424_v46 = vpop.permute.xlu1 %1423 }
 0x21e   :  { %1245 = vmatprep.subr.bf16.mxu1 %v1244_v44  ;;  %v1426_v49 = vunpack.i.h.bf16 %v1424_v46  ;;  %v1431_v57 = vunpack.i.h.bf16 %v1429_v45  ;;  %v1430_v58 = vunpack.i.l.bf16 %v1429_v45  ;;  %v1425_v60 = vunpack.i.l.bf16 %v1424_v46 }
 0x220   :  { %v1248_v0 = vpack.c.bf16 %v1426_v49, %v1421_v52 }
 0x221   :  { %v1743_v47 = vpop.permute.xlu0 %1438  ;;  %v1434_v48 = vpop.permute.xlu1 %1433 }
 0x222   :  { %v1436_v59 = vunpack.i.h.bf16 %v1434_v48  ;;  %v1441_v11 = vunpack.i.h.bf16 %v1743_v47  ;;  %v1435_v13 = vunpack.i.l.bf16 %v1434_v48  ;;  %v1440_v29 = vunpack.i.l.bf16 %v1743_v47 }
 0x224   :  { %v1252_v12 = vpack.c.bf16 %v1436_v59, %v1431_v57 }
 0x225   :  { %v1745_v50 = vpop.permute.xlu1 %1443  ;;  %v1449_v51 = vpop.permute.xlu0 %1448 }
 0x226   :  { %v1451_v54 = vunpack.i.h.bf16 %v1449_v51  ;;  %v1450_v55 = vunpack.i.l.bf16 %v1449_v51  ;;  %v1446_v14 = vunpack.i.h.bf16 %v1745_v50  ;;  %v1445_v31 = vunpack.i.l.bf16 %v1745_v50 }
 0x228   :  { %v354_v61 = vsel %vm69_vm0, %v1451_v54, %v1416_v43  ;;  %v352_v62 = vsel %vm69_vm0, %v1415_v53, %v1450_v55  ;;  %v353_v63 = vsel %vm69_vm0, %v1450_v55, %v1451_v54  ;;  %v1256_v30 = vpack.c.bf16 %v1446_v14, %v1441_v11 }
 0x229   :  { %v1246_v1 = vpack.c.bf16 %v354_v61, %v338_v38  ;;  %v1230_v2 = vpack.c.bf16 %v352_v62, %v1721_v32  ;;  %v1459_v3 = vpop.permute.xlu1 %1458  ;;  %v1454_v4 = vpop.permute.xlu0 %1453  ;;  %v1228_v5 = vpack.c.bf16 %v353_v63, %v337_v39  ;;  %v464_v61 = vld [vmem:[#allocation7] sm:$0xff] }
 0x22a   :  { %v1461_v7 = vunpack.i.h.bf16 %v1459_v3  ;;  %v1460_v8 = vunpack.i.l.bf16 %v1459_v3  ;;  %v1456_v9 = vunpack.i.h.bf16 %v1454_v4  ;;  %v1455_v10 = vunpack.i.l.bf16 %v1454_v4 }
 0x22b   :  { %1229 = vmatprep.subr.bf16.mxu0 %v1228_v5  ;;  %1247 = vmatpush1.bf16.msra.mxu1 %v1246_v1  ;;  %v660_v1 = vlaneseq }
 0x22c   :  { %v384_v15 = vsel %vm101_vm2, %v1461_v7, %v1426_v49  ;;  %v382_v16 = vsel %vm101_vm2, %v1425_v60, %v1460_v8  ;;  %v369_v17 = vsel %vm85_vm1, %v1456_v9, %v1421_v52  ;;  %v367_v18 = vsel %vm85_vm1, %v1420_v56, %v1455_v10  ;;  %1231 = vmatpush1.bf16.msra.mxu0 %v1230_v2 }
 0x22d   :  { %v1250_v19 = vpack.c.bf16 %v384_v15, %v369_v17  ;;  %v1234_v20 = vpack.c.bf16 %v382_v16, %v367_v18  ;;  %1249 = vmatprep.subr.bf16.mxu1 %v1248_v0  ;;  %v1469_v21 = vpop.permute.xlu1 %1468  ;;  %v1464_v22 = vpop.permute.xlu0 %1463  ;;  %v368_v23 = vsel %vm85_vm1, %v1455_v10, %v1456_v9  ;;  %v383_v24 = vsel %vm101_vm2, %v1460_v8, %v1461_v7 }
 0x22e   :  { %v1471_v25 = vunpack.i.h.bf16 %v1469_v21  ;;  %v1470_v26 = vunpack.i.l.bf16 %v1469_v21  ;;  %v1466_v27 = vunpack.i.h.bf16 %v1464_v22  ;;  %v1465_v28 = vunpack.i.l.bf16 %v1464_v22 }
 0x22f   :  { %v1232_v32 = vpack.c.bf16 %v383_v24, %v368_v23  ;;  %1251 = vmatpush1.bf16.msra.mxu1 %v1250_v19  ;;  %v1783_v5 = vshrl.u32 %v660_v1, 7  ;;  %v1598_v16 = vmov 0.0|0.0   ;;  %v1599_v23 = vmov 1.0|1.0  }
 0x230   :  { %v414_v33 = vsel %vm133_vm4, %v1471_v25, %v1436_v59  ;;  %v412_v34 = vsel %vm133_vm4, %v1435_v13, %v1470_v26  ;;  %v399_v35 = vsel %vm117_vm3, %v1466_v27, %v1431_v57  ;;  %v397_v36 = vsel %vm117_vm3, %v1430_v58, %v1465_v28  ;;  %1253 = vmatprep.subr.bf16.mxu1 %v1252_v12 }
 0x231   :  { %v1254_v37 = vpack.c.bf16 %v414_v33, %v399_v35  ;;  %v1238_v38 = vpack.c.bf16 %v412_v34, %v397_v36  ;;  %1233 = vmatprep.subr.bf16.mxu0 %v1232_v32  ;;  %v1479_v39 = vpop.permute.xlu1 %1478  ;;  %v1474_v40 = vpop.permute.xlu0 %1473  ;;  %v398_v41 = vsel %vm117_vm3, %v1465_v28, %v1466_v27  ;;  %v413_v42 = vsel %vm133_vm4, %v1470_v26, %v1471_v25 }
 0x232   :  { %1235 = vmatpush1.bf16.msra.mxu0 %v1234_v20  ;;  %v1481_v43 = vunpack.i.h.bf16 %v1479_v39  ;;  %v1480_v44 = vunpack.i.l.bf16 %v1479_v39  ;;  %v1476_v45 = vunpack.i.h.bf16 %v1474_v40  ;;  %v1475_v46 = vunpack.i.l.bf16 %v1474_v40 }
 0x233   :  { %v1236_v47 = vpack.c.bf16 %v413_v42, %v398_v41  ;;  %1255 = vmatpush1.bf16.msra.mxu1 %v1254_v37  ;;  %v694_v15 = vadd.s32 264, %v1783_v5  ;;  %v695_v17 = vadd.s32 272, %v1783_v5  ;;  %v696_v18 = vadd.s32 280, %v1783_v5 }
 0x234   :  { %v444_v48 = vsel %vm165_vm6, %v1481_v43, %v1446_v14  ;;  %v442_v49 = vsel %vm165_vm6, %v1445_v31, %v1480_v44  ;;  %v429_v50 = vsel %vm149_vm5, %v1476_v45, %v1441_v11  ;;  %v427_v51 = vsel %vm149_vm5, %v1440_v29, %v1475_v46  ;;  %1257 = vmatprep.subr.bf16.mxu1 %v1256_v30  ;;  %v1797_v11 = vld [vmem:[%s2043_s3] ss:$0 sm:$0xff]  ;;  %s1601_s3 = smov [#allocation8]  }
 0x235   :  { %v1258_v52 = vpack.c.bf16 %v444_v48, %v429_v50  ;;  %1237 = vmatprep.subr.bf16.mxu0 %v1236_v47  ;;  %v454_v53 = vpop.permute.xlu1 %453  ;;  %v452_v54 = vpop.permute.xlu0 %451  ;;  %v428_v55 = vsel %vm149_vm5, %v1475_v46, %v1476_v45  ;;  %v443_v56 = vsel %vm165_vm6, %v1480_v44, %v1481_v43  ;;  %v1242_v57 = vpack.c.bf16 %v442_v49, %v427_v51  ;;  %s1037_s6 = sshll.u32 %s1601_s3, 4  ;;  %s1038_s6 = int_to_ptr.vmem [resolvable:$true] %s1037_s6 }
 0x236   :  { %1239 = vmatpush1.bf16.msra.mxu0 %v1238_v38  ;;  %v1240_v58 = vpack.c.bf16 %v443_v56, %v428_v55  ;;  %v458_v63 = vsel %vm181_vm7, %v452_v54, %v454_v53  ;;  %v693_v14 = vadd.s32 256, %v1783_v5  ;;  %v697_v19 = vadd.s32 288, %v1783_v5  ;;  %s1558_s7 = scalar_lea.vmem %s1038_s6, 128  ;;  %p1563_p11 = scmp.lt.s32.totalorder %s1038_s6, %s1038_s6 }
 0x237   :  { %1259 = vmatpush1.bf16.msra.mxu1 %v1258_v52  ;;  %vm753_vm10 = vcmp.eq.s32.totalorder %v694_v15, %v1797_v11  ;;  %v698_v20 = vadd.s32 296, %v1783_v5  ;;  %v677_v21 = vadd.s32 128, %v1783_v5  ;;  %vm754_vm12 = vcmp.eq.s32.totalorder %v695_v17, %v1797_v11  ;;  %p1559_p10 = scmp.ne.s32.totalorder %s1038_s6, %s1558_s7  ;;  %p1564_p12 = scmp.lt.s32.totalorder %s1558_s7, %s1558_s7 }
 0x238   :  { %1241 = vmatprep.subr.bf16.mxu0 %v1240_v58  ;;  %vm752_vm9 = vcmp.eq.s32.totalorder %v693_v14, %v1797_v11  ;;  %vm755_vm13 = vcmp.eq.s32.totalorder %v696_v18, %v1797_v11  ;;  %vm756_vm14 = vcmp.eq.s32.totalorder %v697_v19, %v1797_v11  ;;  %v678_v22 = vadd.s32 136, %v1783_v5 }
 0x239   :  { %v456_v59 = vpop.permute.xlu1 %455  ;;  %v450_v60 = vpop.permute.xlu0 %449  ;;  %vm1293_vm11 = vmpackc.low %vm753_vm10, %vm752_vm9  ;;  %vm757_vm15 = vcmp.eq.s32.totalorder %v698_v20, %v1797_v11  ;;  %vm736_vm1 = vcmp.eq.s32.totalorder %v677_v21, %v1797_v11  ;;  %v662_v24 = vadd.s32 8, %v1783_v5  ;;  %vm720_vm3 = vcmp.eq.s32.totalorder %v1783_v5, %v1797_v11  ;;  %p1565_p13 = por %p1564_p12, %p1563_p11 }
 0x23a   :  { %1243 = vmatpush1.bf16.msra.mxu0 %v1242_v57  ;;  %v459_v62 = vsel %vm181_vm7, %v454_v53, %v456_v59  ;;  %555 = vmatprep.subr.mxu1 %v456_v59  ;;  %v457_v0 = vsel %vm181_vm7, %v450_v60, %v452_v54  ;;  %vm1826_vm4 = vmpackc.low %vm755_vm13, %vm754_vm12  ;;  %vm737_vm5 = vcmp.eq.s32.totalorder %v678_v22, %v1797_v11  ;;  %v699_v26 = vadd.s32 304, %v1783_v5 }
 0x23b   :  { %484 = vmatprep.subr.mxu0 %v458_v63  ;;  %556 = vmatpush1.msra.mxu1 %v459_v62  ;;  %v700_v27 = vadd.s32 312, %v1783_v5  ;;  %v679_v28 = vadd.s32 144, %v1783_v5  ;;  %vm1260_vm6 = vmpackc.low %vm737_vm5, %vm736_vm1  ;;  %vm721_vm7 = vcmp.eq.s32.totalorder %v662_v24, %v1797_v11  ;;  %v680_v29 = vadd.s32 152, %v1783_v5  ;;  %p1566_p0 = pnand %p1565_p13, %p1559_p10 }
 0x23c   :  { %1050 = vmatmul.mubr.msk.f32.vlgmr.msra.gmra.mrb[2].mxu1 %vm2045_vm8, %v464_v61  ;;  %1292 = vmatprep.subr.bf16.mxu1 %v1598_v16  ;;  %v663_v30 = vadd.s32 16, %v1783_v5  ;;  %v664_v31 = vadd.s32 24, %v1783_v5  ;;  %vm1262_vm9 = vmpackc.low %vm721_vm7, %vm720_vm3  ;;  %vm758_vm10 = vcmp.eq.s32.totalorder %v699_v26, %v1797_v11  ;;  %v701_v32 = vadd.s32 320, %v1783_v5 }
 0x23d   :  { %1294 = vmatpush1.bf16.msk.msra.mxu1 %vm1293_vm11, %v1599_v23  ;;  %vm759_vm11 = vcmp.eq.s32.totalorder %v700_v27, %v1797_v11  ;;  %vm738_vm12 = vcmp.eq.s32.totalorder %v679_v28, %v1797_v11  ;;  %vm1853_vm13 = vmpackc.low %vm757_vm15, %vm756_vm14  ;;  %vm739_vm1 = vcmp.eq.s32.totalorder %v680_v29, %v1797_v11  ;;  %v702_v34 = vadd.s32 328, %v1783_v5 }
 0x23e   :  { %485 = vmatpush1.msra.mxu0 %v457_v0  ;;  %1295 = vmatprep.subr.bf16.mxu1 %v1598_v16  ;;  %vm722_vm3 = vcmp.eq.s32.totalorder %v663_v30, %v1797_v11  ;;  %vm723_vm5 = vcmp.eq.s32.totalorder %v664_v31, %v1797_v11  ;;  %v681_v35 = vadd.s32 160, %v1783_v5  ;;  %v682_v36 = vadd.s32 168, %v1783_v5 }
 0x23f   :  { %1049 = vmatmul.mubr.msk.f32.vlgmr.msra.gmra.mrb[2].mxu0 %vm2045_vm8, %v464_v61  ;;  %1261 = vmatprep.subr.msk.bf16.mxu0 %vm1260_vm6, %v1599_v23  ;;  %v665_v37 = vadd.s32 32, %v1783_v5  ;;  %vm1266_vm14 = vmpackc.low %vm723_vm5, %vm722_vm3  ;;  %vm760_vm15 = vcmp.eq.s32.totalorder %v701_v32, %v1797_v11  ;;  %v666_v38 = vadd.s32 40, %v1783_v5  ;;  %v683_v40 = vadd.s32 176, %v1783_v5 }
 0x240   :  { %1263 = vmatpush3.bf16.msk.msra.mxu0 %vm1262_vm9, %v1599_v23  ;;  %vm1873_vm6 = vmpackc.low %vm759_vm11, %vm758_vm10  ;;  %vm740_vm7 = vcmp.eq.s32.totalorder %v681_v35, %v1797_v11  ;;  %vm741_vm9 = vcmp.eq.s32.totalorder %v682_v36, %v1797_v11  ;;  %v703_v41 = vadd.s32 336, %v1783_v5  ;;  %v684_v42 = vadd.s32 184, %v1783_v5 }
 0x241   :  { %1297 = vmatpush1.bf16.msk.msra.mxu1 %vm1826_vm4, %v1599_v23  ;;  %vm1264_vm4 = vmpackc.low %vm739_vm1, %vm738_vm12  ;;  %vm724_vm12 = vcmp.eq.s32.totalorder %v665_v37, %v1797_v11  ;;  %vm761_vm1 = vcmp.eq.s32.totalorder %v702_v34, %v1797_v11  ;;  %vm725_vm11 = vcmp.eq.s32.totalorder %v666_v38, %v1797_v11  ;;  %v704_v44 = vadd.s32 344, %v1783_v5 }
 0x242   :  { %1298 = vmatprep.subr.bf16.mxu1 %v1598_v16  ;;  %1265 = vmatprep.subr.msk.bf16.mxu0 %vm1264_vm4, %v1599_v23  ;;  %vm1268_vm10 = vmpackc.low %vm741_vm9, %vm740_vm7  ;;  %v667_v45 = vadd.s32 48, %v1783_v5  ;;  %v668_v46 = vadd.s32 56, %v1783_v5  ;;  %vm743_vm5 = vcmp.eq.s32.totalorder %v684_v42, %v1797_v11  ;;  %v685_v47 = vadd.s32 192, %v1783_v5 }
 0x243   :  { %vm1891_vm3 = vmpackc.low %vm725_vm11, %vm724_vm12  ;;  %v686_v48 = vadd.s32 200, %v1783_v5  ;;  %v705_v49 = vadd.s32 352, %v1783_v5  ;;  %v669_v50 = vadd.s32 64, %v1783_v5  ;;  %v706_v52 = vadd.s32 360, %v1783_v5 }
 0x244   :  { %1267 = vmatpush3.bf16.msk.msra.mxu0 %vm1266_vm14, %v1599_v23  ;;  %vm726_vm14 = vcmp.eq.s32.totalorder %v667_v45, %v1797_v11  ;;  %vm727_vm7 = vcmp.eq.s32.totalorder %v668_v46, %v1797_v11  ;;  %vm1913_vm9 = vmpackc.low %vm761_vm1, %vm760_vm15  ;;  %vm744_vm12 = vcmp.eq.s32.totalorder %v685_v47, %v1797_v11  ;;  %v670_v53 = vadd.s32 72, %v1783_v5 }
 0x245   :  { %1300 = vmatpush1.bf16.msk.msra.mxu1 %vm1853_vm13, %v1599_v23  ;;  %1269 = vmatprep.subr.msk.bf16.mxu0 %vm1268_vm10, %v1599_v23  ;;  %vm742_vm13 = vcmp.eq.s32.totalorder %v683_v40, %v1797_v11  ;;  %vm745_vm10 = vcmp.eq.s32.totalorder %v686_v48, %v1797_v11  ;;  %vm763_vm15 = vcmp.eq.s32.totalorder %v704_v44, %v1797_v11  ;;  %vm1274_vm1 = vmpackc.low %vm727_vm7, %vm726_vm14  ;;  %v687_v54 = vadd.s32 208, %v1783_v5 }
 0x246   :  { %1301 = vmatprep.subr.bf16.mxu1 %v1598_v16  ;;  %vm1272_vm4 = vmpackc.low %vm743_vm5, %vm742_vm13  ;;  %vm728_vm11 = vcmp.eq.s32.totalorder %v669_v50, %v1797_v11  ;;  %vm729_vm13 = vcmp.eq.s32.totalorder %v670_v53, %v1797_v11  ;;  %v688_v55 = vadd.s32 216, %v1783_v5  ;;  %v671_v56 = vadd.s32 80, %v1783_v5 }
 0x247   :  { %v672_v57 = vadd.s32 88, %v1783_v5  ;;  %vm746_vm5 = vcmp.eq.s32.totalorder %v687_v54, %v1797_v11  ;;  %vm764_vm14 = vcmp.eq.s32.totalorder %v705_v49, %v1797_v11  ;;  %vm765_vm7 = vcmp.eq.s32.totalorder %v706_v52, %v1797_v11 }
 0x248   :  { %1271 = vmatpush3.bf16.msk.msra.mxu0 %vm1891_vm3, %v1599_v23  ;;  %vm1276_vm3 = vmpackc.low %vm745_vm10, %vm744_vm12  ;;  %vm747_vm12 = vcmp.eq.s32.totalorder %v688_v55, %v1797_v11  ;;  %v707_v59 = vadd.s32 368, %v1783_v5  ;;  %v708_v60 = vadd.s32 376, %v1783_v5  ;;  %v689_v61 = vadd.s32 224, %v1783_v5 }
 0x249   :  { %1303 = vmatpush1.bf16.msk.msra.mxu1 %vm1873_vm6, %v1599_v23  ;;  %vm762_vm6 = vcmp.eq.s32.totalorder %v703_v41, %v1797_v11  ;;  %1273 = vmatprep.subr.msk.bf16.mxu0 %vm1272_vm4, %v1599_v23  ;;  %vm1278_vm10 = vmpackc.low %vm729_vm13, %vm728_vm11  ;;  %v690_v62 = vadd.s32 232, %v1783_v5  ;;  %v673_v63 = vadd.s32 96, %v1783_v5  ;;  %v674_v0 = vadd.s32 104, %v1783_v5 }
 0x24a   :  { %1304 = vmatprep.subr.bf16.mxu1 %v1598_v16  ;;  %vm1940_vm4 = vmpackc.low %vm763_vm15, %vm762_vm6  ;;  %vm730_vm6 = vcmp.eq.s32.totalorder %v671_v56, %v1797_v11  ;;  %vm731_vm15 = vcmp.eq.s32.totalorder %v672_v57, %v1797_v11  ;;  %vm766_vm13 = vcmp.eq.s32.totalorder %v707_v59, %v1797_v11  ;;  %v709_v1 = vadd.s32 384, %v1783_v5 }
 0x24b   :  { %vm749_vm11 = vcmp.eq.s32.totalorder %v690_v62, %v1797_v11  ;;  %vm732_vm8 = vcmp.eq.s32.totalorder %v673_v63, %v1797_v11  ;;  %v714_v14 = vadd.s32 424, %v1783_v5  ;;  %v711_v15 = vadd.s32 400, %v1783_v5 }
 0x24c   :  { %1275 = vmatpush3.bf16.msk.msra.mxu0 %vm1274_vm1, %v1599_v23  ;;  %vm748_vm1 = vcmp.eq.s32.totalorder %v689_v61, %v1797_v11  ;;  %v712_v17 = vadd.s32 408, %v1783_v5  ;;  %v691_v18 = vadd.s32 240, %v1783_v5  ;;  %v692_v19 = vadd.s32 248, %v1783_v5 }
 0x24d   :  { %1306 = vmatpush1.bf16.msk.msra.mxu1 %vm1913_vm9, %v1599_v23  ;;  %1277 = vmatprep.subr.msk.bf16.mxu0 %vm1276_vm3, %v1599_v23  ;;  %vm1280_vm9 = vmpackc.low %vm747_vm12, %vm746_vm5  ;;  %vm767_vm5 = vcmp.eq.s32.totalorder %v708_v60, %v1797_v11  ;;  %v675_v21 = vadd.s32 112, %v1783_v5  ;;  %v676_v22 = vadd.s32 120, %v1783_v5  ;;  %v713_v24 = vadd.s32 416, %v1783_v5 }
 0x24e   :  { %1307 = vmatprep.subr.bf16.mxu1 %v1598_v16  ;;  %vm1311_vm3 = vmpackc.low %vm765_vm7, %vm764_vm14  ;;  %vm733_vm14 = vcmp.eq.s32.totalorder %v674_v0, %v1797_v11 }
 0x24f   :  { %vm1282_vm12 = vmpackc.low %vm731_vm15, %vm730_vm6 }
 0x250   :  { %1279 = vmatpush3.bf16.msk.msra.mxu0 %vm1278_vm10, %v1599_v23  ;;  %vm1314_vm7 = vmpackc.low %vm767_vm5, %vm766_vm13  ;;  %vm750_vm13 = vcmp.eq.s32.totalorder %v691_v18, %v1797_v11  ;;  %vm751_vm5 = vcmp.eq.s32.totalorder %v692_v19, %v1797_v11 }
 0x251   :  { %1309 = vmatpush1.bf16.msk.msra.mxu1 %vm1940_vm4, %v1599_v23  ;;  %1281 = vmatprep.subr.msk.bf16.mxu0 %vm1280_vm9, %v1599_v23  ;;  %vm1284_vm4 = vmpackc.low %vm749_vm11, %vm748_vm1  ;;  %vm768_vm9 = vcmp.eq.s32.totalorder %v709_v1, %v1797_v11  ;;  %vm773_vm1 = vcmp.eq.s32.totalorder %v714_v14, %v1797_v11  ;;  %vm771_vm11 = vcmp.eq.s32.totalorder %v712_v17, %v1797_v11 }
 0x252   :  { %1310 = vmatprep.subr.bf16.mxu1 %v1598_v16  ;;  %vm1286_vm10 = vmpackc.low %vm733_vm14, %vm732_vm8  ;;  %vm770_vm8 = vcmp.eq.s32.totalorder %v711_v15, %v1797_v11  ;;  %v1105_v20 = vsel %vm773_vm1, 1.0, %v1596_v6  ;;  %vm735_vm14 = vcmp.eq.s32.totalorder %v676_v22, %v1797_v11  ;;  %v1600_v6 = vmov 1.0  }
 0x253   :  { %v1323_v25 = vpack.c.bf16 %v1105_v20, %v1600_v6 }
 0x254   :  { %1283 = vmatpush3.bf16.msk.msra.mxu0 %vm1282_vm12, %v1599_v23  ;;  %vm1288_vm12 = vmpackc.low %vm751_vm5, %vm750_vm13 }
 0x255   :  { %1312 = vmatpush1.bf16.msk.msra.mxu1 %vm1311_vm3, %v1599_v23  ;;  %1285 = vmatprep.subr.msk.bf16.mxu0 %vm1284_vm4, %v1599_v23  ;;  %vm1320_vm3 = vmpackc.low %vm771_vm11, %vm770_vm8  ;;  %vm734_vm4 = vcmp.eq.s32.totalorder %v675_v21, %v1797_v11 }
 0x256   :  { %1313 = vmatprep.subr.bf16.mxu1 %v1598_v16 }
 0x258   :  { %1287 = vmatpush3.bf16.msk.msra.mxu0 %vm1286_vm10, %v1599_v23  ;;  %vm772_vm10 = vcmp.eq.s32.totalorder %v713_v24, %v1797_v11 }
 0x259   :  { %1315 = vmatpush1.bf16.msk.msra.mxu1 %vm1314_vm7, %v1599_v23  ;;  %1289 = vmatprep.subr.msk.bf16.mxu0 %vm1288_vm12, %v1599_v23  ;;  %vm1290_vm7 = vmpackc.low %vm735_vm14, %vm734_vm4 }
 0x25a   :  { %1316 = vmatprep.subr.bf16.mxu1 %v1598_v16 }
 0x25c   :  { %1291 = vmatpush3.bf16.msk.msra.mxu0 %vm1290_vm7, %v1599_v23 }
 0x30f   :  { %v1778_v2 = vpop.f32.mrb[2].mxu1 }
 0x310   :  { %v1780_v3 = vpop.f32.mrb[3].mxu1  ;;  %v612_v7 = vmax.f32 %v1778_v2, 0.0 }
 0x311   :  { %v613_v4 = vmax.f32 %v1780_v3, 0.0 }
 0x312   :  { %v1786_v8 = vpop.f32.mrb[2].mxu0 }
 0x313   :  { %v1788_v9 = vpop.f32.mrb[3].mxu0  ;;  %624 = vrot.lane.b32.xlu1 %v613_v4, %s1591_s2  ;;  %v610_v12 = vmax.f32 %v1786_v8, 0.0 }
 0x314   :  { %v611_v10 = vmax.f32 %v1788_v9, 0.0 }
 0x316   :  { %v1482_v13 = vpack.i.bf16 %v612_v7, %v611_v10 }
 0x318   :  { %1483 = vrot.lane.b32.xlu0 %v1482_v13, %s1591_s2  ;;  %v710_v13 = vadd.s32 392, %v1783_v5 }
 0x31a   :  { %vm769_vm6 = vcmp.eq.s32.totalorder %v710_v13, %v1797_v11 }
 0x31b   :  { %vm1317_vm15 = vmpackc.low %vm769_vm6, %vm768_vm9  ;;  %vm886_vm9 = vcmask 1042432  }
 0x31c   :  { %618 = vrot.lane.b32.xlu0 %v610_v12, %s1591_s2  ;;  %1318 = vmatpush1.bf16.msk.msra.mxu1 %vm1317_vm15, %v1599_v23  ;;  %vm1324_vm6 = vmpackc.low %vm886_vm9, %vm772_vm10  ;;  %vm2058_vm15 = vcmask 588800  }
 0x31d   :  { %1319 = vmatprep.subr.bf16.mxu1 %v1598_v16 }
 0x320   :  { %1321 = vmatpush1.bf16.msk.msra.mxu1 %vm1320_vm3, %v1599_v23 }
 0x321   :  { %1322 = vmatprep.subr.bf16.mxu1 %v1598_v16 }
 0x324   :  { %1325 = vmatpush1.bf16.msk.msra.mxu1 %vm1324_vm6, %v1323_v25 }
 0x385   :  { %v625_v28 = vpop.permute.xlu1 %624 }
 0x386   :  { %v636_v34 = vmax.f32 %v613_v4, %v625_v28 }
 0x38a   :  { %v1484_v5 = vpop.permute.xlu0 %1483 }
 0x38b   :  { %v1486_v26 = vunpack.i.h.bf16 %v1484_v5  ;;  %v1485_v27 = vunpack.i.l.bf16 %v1484_v5 }
 0x38d   :  { %v628_v29 = vsel %vm101_vm2, %v1486_v26, %v625_v28  ;;  %v627_v16 = vsel %vm101_vm2, %v1485_v27, %v1486_v26 }
 0x38e   :  { %v619_v30 = vpop.permute.xlu0 %618  ;;  %v634_v31 = vmax.f32 %v611_v10, %v627_v16  ;;  %v635_v11 = vmax.f32 %v612_v7, %v628_v29 }
 0x38f   :  { %v626_v32 = vsel %vm101_vm2, %v619_v30, %v1485_v27  ;;  %vm882_vm2 = vcmask 351232  }
 0x390   :  { %v633_v23 = vmax.f32 %v610_v12, %v626_v32  ;;  %v1487_v33 = vpack.i.bf16 %v635_v11, %v634_v31 }
 0x392   :  { %1488 = vrot.lane.b32.xlu1 %v1487_v33, %s1590_s24  ;;  %641 = vrot.lane.b32.xlu0 %v633_v23, %s1590_s24 }
 0x396   :  { %647 = vrot.lane.b32.xlu1 %v636_v34, %s1590_s24 }
 0x404   :  { %v1489_v9 = vpop.permute.xlu1 %1488  ;;  %v642_v2 = vpop.permute.xlu0 %641 }
 0x405   :  { %v1491_v10 = vunpack.i.h.bf16 %v1489_v9  ;;  %v1490_v35 = vunpack.i.l.bf16 %v1489_v9 }
 0x407   :  { %v649_v7 = vsel %vm69_vm0, %v642_v2, %v1490_v35  ;;  %v650_v36 = vsel %vm69_vm0, %v1490_v35, %v1491_v10 }
 0x408   :  { %v656_v8 = vmax.f32 %v633_v23, %v649_v7  ;;  %v648_v12 = vpop.permute.xlu1 %647  ;;  %v657_v37 = vmax.f32 %v634_v31, %v650_v36 }
 0x409   :  { %v651_v38 = vsel %vm69_vm0, %v1491_v10, %v648_v12  ;;  %v659_v39 = vmax.f32 %v636_v34, %v648_v12 }
 0x40a   :  { %v658_v40 = vmax.f32 %v635_v11, %v651_v38  ;;  %954 = vmatprep.mubr.f32.mxu0 %v657_v37 }
 0x40b   :  { %955 = vmatmul.mubr.f32.vlgmr.msra.gmra.mrb[4].mxu0 %v656_v8  ;;  %1160 = vmatprep.mubr.msk.f32.mxu1 %vm882_vm2, %v659_v39 }
 0x40c   :  { %1025 = vmatmul.mubr.f32.vlgmr.msra.gmra.mrb[4].mxu1 %v658_v40 }
 0x4de   :  { %v1193_v3 = vpop.f32.mrb[4].mxu0 }
 0x4df   :  { %v1194_v4 = vpop.f32.mrb[5].mxu0  ;;  %v1026_v41 = vpop.f32.mrb[4].mxu1 }
 0x4e0   :  { %v1195_v42 = vadd.f32 %v1194_v4, %v1193_v3  ;;  %v1028_v43 = vpop.f32.mrb[5].mxu1 }
 0x4e2   :  { %v1027_v44 = vadd.f32 %v1195_v42, %v1026_v41 }
 0x4e4   :  { %1030 = vst.msk [vmem:[#allocation8] sm:$0xff] %vm2058_vm15, %v1027_v44 }
 0x4e5   :  { %1569 = shalt.err (!%p1566_p0)
}
 0x4e6   :  { %s1570_s10 = scalar_lea.hbm %s2044_s4, 128 }
 0x4e7   :  { %p1571_p1 = scmp.ne.s32.totalorder %s2044_s4, %s1570_s10  ;;  %p1574_p2 = scmp.lt.u32.totalorder %s1570_s10, %s2044_s4 }
 0x4e9   :  { %p1576_p3 = pnand %p1574_p2, %p1571_p1 }
 0x4eb   :  { %1579 = shalt.err (!%p1576_p3)
}
 0x4ec   :  { %1040 = dma.vmem_to_hbm [thread:$0]  %s1038_s6, 128, %s2044_s4, [#allocation4]  }
 0x4ed   :  { %1584 = dma.done.wait [#allocation4], 128  }
 0x4ee   :  { %1585 = vsyncadd [#allocation4], 4294967168 }
 0x4ef   :  { %1044 = vsyncpa [#allocation3], 1 }
 0x4f0   :  { %1045 = vsyncpa [#allocation6], 1 }
 0x4f1   :  { %1046 = vsyncpa [#allocation4], 1 }

</bundles_post_ra>
